<compile_context>
chip_gen: v7x
topology: tpu7x:2x2x1
jax: 0.10.0
libtpu: 0.0.40
codegen_flags: <defaults>
</compile_context>

<pallas_src>
import math

import jax
import jax.numpy as jnp
from jax.experimental import pallas as pl
from jax.experimental.pallas import tpu as pltpu


# ------------------------------ Pallas kernels ------------------------------ #

def _encoder_tail(a_ref, x_ref, emb_bf16, w1x_ref, w1e_ref, b1_ref,
                  w2_ref, b2_ref, z_ref):
    """Two GCN layers for the current encoder (grid axis = encoder index)."""
    a = a_ref[...]                                                # bf16 [N, N]
    # layer 1: h = relu(A @ ([x | embed] @ W1) + b1); W1 arrives pre-split.
    xw = (jnp.dot(x_ref[...], w1x_ref[0], preferred_element_type=jnp.float32)
          + jnp.dot(emb_bf16, w1e_ref[0], preferred_element_type=jnp.float32))
    h = jnp.maximum(
        jnp.dot(a, xw.astype(jnp.bfloat16), preferred_element_type=jnp.float32)
        + b1_ref[0], 0.0)
    # layer 2 (mu/logvar heads fused for 'vgae'): z = A @ (h @ W2) + b2
    hw = jnp.dot(h.astype(jnp.bfloat16), w2_ref[0],
                 preferred_element_type=jnp.float32)
    z = (jnp.dot(a, hw.astype(jnp.bfloat16), preferred_element_type=jnp.float32)
         + b2_ref[0])
    z_ref[0] = z.astype(z_ref.dtype)


def _bi_encoder_kernel_new_embed(a_ref, x_ref, s_ref, ws_ref, bs_ref,
                                 w1x_ref, w1e_ref, b1_ref, w2_ref, b2_ref,
                                 z_ref, emb_ref):
    """Encoder forward that also builds + emits the sentence-embed cache."""
    emb_f32 = (jnp.dot(s_ref[...], ws_ref[0],
                       preferred_element_type=jnp.float32) + bs_ref[0])
    emb_ref[0] = emb_f32.astype(emb_ref.dtype)
    _encoder_tail(a_ref, x_ref, emb_f32.astype(jnp.bfloat16),
                  w1x_ref, w1e_ref, b1_ref, w2_ref, b2_ref, z_ref)


def _bi_encoder_kernel_cached_embed(a_ref, x_ref, e_ref,
                                    w1x_ref, w1e_ref, b1_ref, w2_ref, b2_ref,
                                    z_ref):
    """Encoder forward reusing a cached sentence embed."""
    _encoder_tail(a_ref, x_ref, e_ref[0],
                  w1x_ref, w1e_ref, b1_ref, w2_ref, b2_ref, z_ref)


# ------------------------------ fused launcher ------------------------------ #

def _fused_bi_encoder(a_norm, x, sent_x, embed_stacked,
                      ws, bs, w1x, w1e, b1, w2, b2):
    """Run BOTH encoders in one pallas_call; grid axis 0 (size 2) = encoder."""
    n, xd = x.shape
    sd = sent_x.shape[1]
    sp = w1e.shape[1]
    hid = w1x.shape[2]
    out_w = w2.shape[2]
    cached = embed_stacked is not None

    bf = jnp.bfloat16
    a_bf = a_norm.astype(bf)
    x_bf = x.astype(bf)

    full = lambda e: (0, 0)
    per_enc = lambda e: (e, 0, 0)

    weight_specs = [
        pl.BlockSpec((1, xd, hid), per_enc),     # W1 (x rows)
        pl.BlockSpec((1, sp, hid), per_enc),     # W1 (embed rows)
        pl.BlockSpec((1, 1, hid), per_enc),      # b1
        pl.BlockSpec((1, hid, out_w), per_enc),  # W2 (vgae: [W2|W3])
        pl.BlockSpec((1, 1, out_w), per_enc),    # b2
    ]
    z_shape = jax.ShapeDtypeStruct((2, n, out_w), jnp.float32)
    z_spec = pl.BlockSpec((1, n, out_w), per_enc)

    if cached:
        inputs = (a_bf, x_bf, embed_stacked.astype(bf),
                  w1x.astype(bf), w1e.astype(bf), b1, w2.astype(bf), b2)
        in_specs = [pl.BlockSpec((n, n), full),
                    pl.BlockSpec((n, xd), full),
                    pl.BlockSpec((1, n, sp), per_enc)] + weight_specs
        out_shape = z_shape
        out_specs = z_spec
        kernel = _bi_encoder_kernel_cached_embed
    else:
        inputs = (a_bf, x_bf, sent_x.astype(bf),
                  ws.astype(bf), bs,
                  w1x.astype(bf), w1e.astype(bf), b1, w2.astype(bf), b2)
        in_specs = [pl.BlockSpec((n, n), full),
                    pl.BlockSpec((n, xd), full),
                    pl.BlockSpec((n, sd), full),
                    pl.BlockSpec((1, sd, sp), per_enc),
                    pl.BlockSpec((1, 1, sp), per_enc)] + weight_specs
        out_shape = (z_shape, jax.ShapeDtypeStruct((2, n, sp), jnp.float32))
        out_specs = (z_spec, pl.BlockSpec((1, n, sp), per_enc))
        kernel = _bi_encoder_kernel_new_embed

    # advisory cost hint for XLA's scheduler
    flops_per_enc = 2 * n * (xd * hid + sp * hid + n * hid + hid * out_w + n * out_w)
    if not cached:
        flops_per_enc += 2 * n * sd * sp
    bytes_accessed = sum(int(v.size) * v.dtype.itemsize for v in inputs)
    for s in jax.tree_util.tree_leaves(out_shape):
        bytes_accessed += math.prod(s.shape) * jnp.dtype(s.dtype).itemsize

    return pl.pallas_call(
        kernel,
        out_shape=out_shape,
        grid=(2,),
        in_specs=in_specs,
        out_specs=out_specs,
        compiler_params=pltpu.CompilerParams(
            dimension_semantics=("parallel",)),
        cost_estimate=pl.CostEstimate(flops=2 * flops_per_enc,
                                      transcendentals=0,
                                      bytes_accessed=bytes_accessed),
    )(*inputs)


# ------------------------------- glue (JAX) --------------------------------- #

def normalized_adj(edge_index, n):
    """Symmetric GCN normalization: D^-1/2 (A + A^T + I) D^-1/2 (dense, small N)."""
    a = jnp.zeros((n, n), jnp.float32)
    a = a.at[edge_index[0], edge_index[1]].set(1.0)
    a = a.at[edge_index[1], edge_index[0]].set(1.0)
    a = jnp.minimum(a + jnp.eye(n, dtype=jnp.float32), 1.0)
    d = a.sum(axis=-1)
    dinv = 1.0 / jnp.sqrt(jnp.maximum(d, 1e-12))
    return a * dinv[:, None] * dinv[None, :]


def bi_encoder_forward(x, sent_x, edge_index, embed, params,
                       ret_type="gae", a_norm=None):
    """BiEncoder.forward: both encoders fused into one Pallas kernel launch."""
    if a_norm is None:          # prefer precomputing a_norm once per graph
        a_norm = normalized_adj(edge_index, x.shape[0])
    x_dim = x.shape[1]
    enc = (params["enc1"], params["enc2"])

    def stk(name):
        return jnp.stack([p[name] for p in enc], axis=0)

    ws = stk("Ws")
    bs = stk("bs")[:, None, :]
    w1 = stk("W1")
    w1x, w1e = w1[:, :x_dim, :], w1[:, x_dim:, :]
    b1 = stk("b1")[:, None, :]
    if ret_type == "gae":
        w2 = stk("W2")
        b2 = stk("b2")[:, None, :]
    else:
        # fuse mu / logvar heads into one (hidden, 2*OUT) weight
        w2 = jnp.concatenate([stk("W2"), stk("W3")], axis=-1)
        b2 = jnp.concatenate([stk("b2"), stk("b3")], axis=-1)[:, None, :]

    embed_stacked = None if embed is None else jnp.stack([embed[0], embed[1]], 0)

    res = _fused_bi_encoder(a_norm, x, sent_x, embed_stacked,
                            ws, bs, w1x, w1e, b1, w2, b2)
    if embed is None:
        z, emb = res
        embed_out = (emb[0], emb[1])
    else:
        z = res
        embed_out = (embed[0], embed[1])

    if ret_type == "gae":
        return jnp.concatenate([z[0], z[1]], axis=-1), embed_out
    out_dim = params["enc1"]["W2"].shape[1]
    mu = jnp.concatenate([z[0, :, :out_dim], z[1, :, :out_dim]], axis=-1)
    logvar = jnp.concatenate([z[0, :, out_dim:], z[1, :, out_dim:]], axis=-1)
    return mu, logvar, embed_out


# ---------------------------- parameter init --------------------------------- #

def _glorot(key, shape):
    fan_in, fan_out = shape
    lim = (6.0 / (fan_in + fan_out)) ** 0.5
    return jax.random.uniform(key, shape, jnp.float32, -lim, lim)


def init_encoder_params(key, x_dim, sent_dim, sent_proj, hidden, out):
    ks = jax.random.split(key, 4)
    feat = x_dim + sent_proj
    return {
        "Ws": _glorot(ks[0], (sent_dim, sent_proj)),
        "bs": jnp.zeros((sent_proj,), jnp.float32),
        "W1": _glorot(ks[1], (feat, hidden)),
        "b1": jnp.zeros((hidden,), jnp.float32),
        "W2": _glorot(ks[2], (hidden, out)),
        "b2": jnp.zeros((out,), jnp.float32),
        # extra head used only by the 'vgae' branch
        "W3": _glorot(ks[3], (hidden, out)),
        "b3": jnp.zeros((out,), jnp.float32),
    }


# ------------------- pure-JAX reference (same bf16 casts) -------------------- #

def _mxu(a, b):
    return jnp.dot(a.astype(jnp.bfloat16), b.astype(jnp.bfloat16),
                   preferred_element_type=jnp.float32)


def _ref_encoder(x, sent_x, a_norm, p, embed=None, vgae=False):
    if embed is None:
        embed = _mxu(sent_x, p["Ws"]) + p["bs"]
    xd = x.shape[1]
    xw = _mxu(x, p["W1"][:xd]) + _mxu(embed, p["W1"][xd:])
    h = jnp.maximum(_mxu(a_norm, xw) + p["b1"], 0.0)

    def head(w, b):
        return _mxu(a_norm, _mxu(h, w)) + b

    if vgae:
        return head(p["W2"], p["b2"]), head(p["W3"], p["b3"]), embed
    return head(p["W2"], p["b2"]), embed


def _ref_encoder_f32(x, sent_x, a_norm, p):
    embed = sent_x @ p["Ws"] + p["bs"]
    feat = jnp.concatenate([x, embed], axis=-1)
    h = jnp.maximum(a_norm @ (feat @ p["W1"]) + p["b1"], 0.0)
    return a_norm @ (h @ p["W2"]) + p["b2"]


# ---------------------------------- main ------------------------------------- #

if __name__ == "__main__":
    N, X_DIM, SENT_DIM, SENT_PROJ, HIDDEN, OUT, E = 16, 8, 12, 8, 32, 16, 24

    key = jax.random.PRNGKey(0)
    k_x, k_s, k_e, k_p1, k_p2 = jax.random.split(key, 5)

    x = jax.random.normal(k_x, (N, X_DIM), jnp.float32)
    sent_x = jax.random.normal(k_s, (N, SENT_DIM), jnp.float32)
    edge_index = jax.random.randint(k_e, (2, E), 0, N, jnp.int32)

    params = {
        "enc1": init_encoder_params(k_p1, X_DIM, SENT_DIM, SENT_PROJ, HIDDEN, OUT),
        "enc2": init_encoder_params(k_p2, X_DIM, SENT_DIM, SENT_PROJ, HIDDEN, OUT),
    }

    # Normalized adjacency hoisted out of the per-forward path: once per graph.
    a_norm = normalized_adj(edge_index, N)

    fwd = jax.jit(bi_encoder_forward, static_argnames=("ret_type",))

    # ---- 'gae' branch, embed=None: builds the sentence-embed cache ----
    out, (embed1, embed2) = fwd(x, sent_x, edge_index, None, params,
                                ret_type="gae", a_norm=a_norm)
    out = jax.block_until_ready(out)
    jax.block_until_ready(embed1)
    jax.block_until_ready(embed2)
    assert out.shape == (N, 2 * OUT), out.shape
    assert embed1.shape == (N, SENT_PROJ)

    # reference with matching bf16-input / f32-accumulate math
    z1, e1 = _ref_encoder(x, sent_x, a_norm, params["enc1"])
    z2, e2 = _ref_encoder(x, sent_x, a_norm, params["enc2"])
    ref_out = jnp.concatenate([z1, z2], axis=-1)
    assert jnp.allclose(out, ref_out, atol=1e-2, rtol=1e-2)
    assert jnp.allclose(embed1, e1, atol=1e-2, rtol=1e-2)
    assert jnp.allclose(embed2, e2, atol=1e-2, rtol=1e-2)

    # loose sanity vs. full-f32 math (bf16 MXU inputs => relaxed tolerance)
    ref_f32 = jnp.concatenate(
        [_ref_encoder_f32(x, sent_x, a_norm, params["enc1"]),
         _ref_encoder_f32(x, sent_x, a_norm, params["enc2"])], axis=-1)
    assert jnp.allclose(out, ref_f32, atol=0.15, rtol=0.15)

    # ---- second call reusing the cached embeds ----
    out2, _ = fwd(x, sent_x, edge_index, (embed1, embed2), params,
                  ret_type="gae", a_norm=a_norm)
    jax.block_until_ready(out2)
    assert jnp.allclose(out, out2, atol=1e-5)

    # ---- 'vgae' branch (fused mu/logvar heads) ----
    mu, logvar, _ = fwd(x, sent_x, edge_index, None, params,
                        ret_type="vgae", a_norm=a_norm)
    jax.block_until_ready(mu)
    assert mu.shape == (N, 2 * OUT) and logvar.shape == (N, 2 * OUT)
    m1, v1, _ = _ref_encoder(x, sent_x, a_norm, params["enc1"], vgae=True)
    m2, v2, _ = _ref_encoder(x, sent_x, a_norm, params["enc2"], vgae=True)
    assert jnp.allclose(mu, jnp.concatenate([m1, m2], -1), atol=1e-2, rtol=1e-2)
    assert jnp.allclose(logvar, jnp.concatenate([v1, v2], -1), atol=1e-2, rtol=1e-2)

    print("KERNEL_OK")
</pallas_src>

<mosaic_0001>
module attributes {stable_mosaic.version = 11 : i64} {
  func.func @_bi_encoder_kernel_new_embed(%arg0: i32, %arg1: memref<16x16xbf16, #tpu.memory_space<vmem>>, %arg2: memref<16x8xbf16, #tpu.memory_space<vmem>>, %arg3: memref<16x12xbf16, #tpu.memory_space<vmem>>, %arg4: memref<1x12x8xbf16, #tpu.memory_space<vmem>>, %arg5: memref<1x1x8xf32, #tpu.memory_space<vmem>>, %arg6: memref<1x8x32xbf16, #tpu.memory_space<vmem>>, %arg7: memref<1x8x32xbf16, #tpu.memory_space<vmem>>, %arg8: memref<1x1x32xf32, #tpu.memory_space<vmem>>, %arg9: memref<1x32x16xbf16, #tpu.memory_space<vmem>>, %arg10: memref<1x1x16xf32, #tpu.memory_space<vmem>>, %arg11: memref<1x16x16xf32, #tpu.memory_space<vmem>>, %arg12: memref<1x16x8xf32, #tpu.memory_space<vmem>>) attributes {dimension_semantics = [#tpu.dimension_semantics<parallel>], iteration_bounds = array<i64: 2>, scalar_prefetch = 0 : i64, scratch_operands = 0 : i64, tpu.core_type = #tpu.core_type<tc>, window_params = [{pipeline_mode = #tpu.pipeline_mode<synchronous>, transform_indices = @transform_0, window_bounds = array<i64: 16, 16>}, {pipeline_mode = #tpu.pipeline_mode<synchronous>, transform_indices = @transform_1, window_bounds = array<i64: 16, 8>}, {pipeline_mode = #tpu.pipeline_mode<synchronous>, transform_indices = @transform_2, window_bounds = array<i64: 16, 12>}, {transform_indices = @transform_3, window_bounds = array<i64: 1, 12, 8>}, {transform_indices = @transform_4, window_bounds = array<i64: 1, 1, 8>}, {transform_indices = @transform_5, window_bounds = array<i64: 1, 8, 32>}, {transform_indices = @transform_6, window_bounds = array<i64: 1, 8, 32>}, {transform_indices = @transform_7, window_bounds = array<i64: 1, 1, 32>}, {transform_indices = @transform_8, window_bounds = array<i64: 1, 32, 16>}, {transform_indices = @transform_9, window_bounds = array<i64: 1, 1, 16>}, {transform_indices = @transform_10, window_bounds = array<i64: 1, 16, 16>}, {transform_indices = @transform_11, window_bounds = array<i64: 1, 16, 8>}]} {
    %c0 = arith.constant 0 : index
    %c0_0 = arith.constant 0 : index
    %0 = vector.load %arg3[%c0, %c0_0] : memref<16x12xbf16, #tpu.memory_space<vmem>>, vector<16x12xbf16>
    %c0_1 = arith.constant 0 : index
    %c0_2 = arith.constant 0 : index
    %c0_3 = arith.constant 0 : index
    %1 = vector.load %arg4[%c0_1, %c0_2, %c0_3] : memref<1x12x8xbf16, #tpu.memory_space<vmem>>, vector<1x12x8xbf16>
    %2 = vector.shape_cast %1 : vector<1x12x8xbf16> to vector<12x8xbf16>
    %cst = arith.constant dense<0.000000e+00> : vector<16x8xf32>
    %3 = tpu.matmul %0, %2, %cst {dimension_numbers = #tpu.dot_dimension_numbers<[1], [0], [0], [1], [0, 0, 1, 1], [], []>} : vector<16x12xbf16>, vector<12x8xbf16>, vector<16x8xf32> -> vector<16x8xf32>
    %c0_4 = arith.constant 0 : index
    %c0_5 = arith.constant 0 : index
    %c0_6 = arith.constant 0 : index
    %4 = vector.load %arg5[%c0_4, %c0_5, %c0_6] : memref<1x1x8xf32, #tpu.memory_space<vmem>>, vector<1x1x8xf32>
    %5 = vector.shape_cast %4 : vector<1x1x8xf32> to vector<1x8xf32>
    %6 = vector.broadcast %5 : vector<1x8xf32> to vector<16x8xf32>
    %7 = arith.addf %3, %6 : vector<16x8xf32>
    %c0_7 = arith.constant 0 : index
    %c0_8 = arith.constant 0 : index
    %c0_9 = arith.constant 0 : index
    %8 = vector.load %arg12[%c0_7, %c0_8, %c0_9] : memref<1x16x8xf32, #tpu.memory_space<vmem>>, vector<1x16x8xf32>
    %9 = vector.shape_cast %8 : vector<1x16x8xf32> to vector<16x8xf32>
    %10 = vector.shape_cast %7 : vector<16x8xf32> to vector<1x16x8xf32>
    tpu.vector_store %arg12[%c0_7, %c0_8, %c0_9], %10 {strides = array<i32>} : memref<1x16x8xf32, #tpu.memory_space<vmem>>, vector<1x16x8xf32>,
    %11 = arith.truncf %7 : vector<16x8xf32> to vector<16x8xbf16>
    %c0_10 = arith.constant 0 : index
    %c0_11 = arith.constant 0 : index
    %12 = vector.load %arg1[%c0_10, %c0_11] : memref<16x16xbf16, #tpu.memory_space<vmem>>, vector<16x16xbf16>
    %c0_12 = arith.constant 0 : index
    %c0_13 = arith.constant 0 : index
    %13 = vector.load %arg2[%c0_12, %c0_13] : memref<16x8xbf16, #tpu.memory_space<vmem>>, vector<16x8xbf16>
    %c0_14 = arith.constant 0 : index
    %c0_15 = arith.constant 0 : index
    %c0_16 = arith.constant 0 : index
    %14 = vector.load %arg6[%c0_14, %c0_15, %c0_16] : memref<1x8x32xbf16, #tpu.memory_space<vmem>>, vector<1x8x32xbf16>
    %15 = vector.shape_cast %14 : vector<1x8x32xbf16> to vector<8x32xbf16>
    %cst_17 = arith.constant dense<0.000000e+00> : vector<16x32xf32>
    %16 = tpu.matmul %13, %15, %cst_17 {dimension_numbers = #tpu.dot_dimension_numbers<[1], [0], [0], [1], [0, 0, 1, 1], [], []>} : vector<16x8xbf16>, vector<8x32xbf16>, vector<16x32xf32> -> vector<16x32xf32>
    %c0_18 = arith.constant 0 : index
    %c0_19 = arith.constant 0 : index
    %c0_20 = arith.constant 0 : index
    %17 = vector.load %arg7[%c0_18, %c0_19, %c0_20] : memref<1x8x32xbf16, #tpu.memory_space<vmem>>, vector<1x8x32xbf16>
    %18 = vector.shape_cast %17 : vector<1x8x32xbf16> to vector<8x32xbf16>
    %cst_21 = arith.constant dense<0.000000e+00> : vector<16x32xf32>
    %19 = tpu.matmul %11, %18, %cst_21 {dimension_numbers = #tpu.dot_dimension_numbers<[1], [0], [0], [1], [0, 0, 1, 1], [], []>} : vector<16x8xbf16>, vector<8x32xbf16>, vector<16x32xf32> -> vector<16x32xf32>
    %20 = arith.addf %16, %19 : vector<16x32xf32>
    %21 = arith.truncf %20 : vector<16x32xf32> to vector<16x32xbf16>
    %cst_22 = arith.constant dense<0.000000e+00> : vector<16x32xf32>
    %22 = tpu.matmul %12, %21, %cst_22 {dimension_numbers = #tpu.dot_dimension_numbers<[1], [0], [0], [1], [0, 0, 1, 1], [], []>} : vector<16x16xbf16>, vector<16x32xbf16>, vector<16x32xf32> -> vector<16x32xf32>
    %c0_23 = arith.constant 0 : index
    %c0_24 = arith.constant 0 : index
    %c0_25 = arith.constant 0 : index
    %23 = vector.load %arg8[%c0_23, %c0_24, %c0_25] : memref<1x1x32xf32, #tpu.memory_space<vmem>>, vector<1x1x32xf32>
    %24 = vector.shape_cast %23 : vector<1x1x32xf32> to vector<1x32xf32>
    %25 = vector.broadcast %24 : vector<1x32xf32> to vector<16x32xf32>
    %26 = arith.addf %22, %25 : vector<16x32xf32>
    %cst_26 = arith.constant 0.000000e+00 : f32
    %27 = vector.broadcast %cst_26 : f32 to vector<16x32xf32>
    %28 = arith.maximumf %26, %27 : vector<16x32xf32>
    %29 = arith.truncf %28 : vector<16x32xf32> to vector<16x32xbf16>
    %c0_27 = arith.constant 0 : index
    %c0_28 = arith.constant 0 : index
    %c0_29 = arith.constant 0 : index
    %30 = vector.load %arg9[%c0_27, %c0_28, %c0_29] : memref<1x32x16xbf16, #tpu.memory_space<vmem>>, vector<1x32x16xbf16>
    %31 = vector.shape_cast %30 : vector<1x32x16xbf16> to vector<32x16xbf16>
    %cst_30 = arith.constant dense<0.000000e+00> : vector<16x16xf32>
    %32 = tpu.matmul %29, %31, %cst_30 {dimension_numbers = #tpu.dot_dimension_numbers<[1], [0], [0], [1], [0, 0, 1, 1], [], []>} : vector<16x32xbf16>, vector<32x16xbf16>, vector<16x16xf32> -> vector<16x16xf32>
    %33 = arith.truncf %32 : vector<16x16xf32> to vector<16x16xbf16>
    %cst_31 = arith.constant dense<0.000000e+00> : vector<16x16xf32>
    %34 = tpu.matmul %12, %33, %cst_31 {dimension_numbers = #tpu.dot_dimension_numbers<[1], [0], [0], [1], [0, 0, 1, 1], [], []>} : vector<16x16xbf16>, vector<16x16xbf16>, vector<16x16xf32> -> vector<16x16xf32>
    %c0_32 = arith.constant 0 : index
    %c0_33 = arith.constant 0 : index
    %c0_34 = arith.constant 0 : index
    %35 = vector.load %arg10[%c0_32, %c0_33, %c0_34] : memref<1x1x16xf32, #tpu.memory_space<vmem>>, vector<1x1x16xf32>
    %36 = vector.shape_cast %35 : vector<1x1x16xf32> to vector<1x16xf32>
    %37 = vector.broadcast %36 : vector<1x16xf32> to vector<16x16xf32>
    %38 = arith.addf %34, %37 : vector<16x16xf32>
    %c0_35 = arith.constant 0 : index
    %c0_36 = arith.constant 0 : index
    %c0_37 = arith.constant 0 : index
    %39 = vector.load %arg11[%c0_35, %c0_36, %c0_37] : memref<1x16x16xf32, #tpu.memory_space<vmem>>, vector<1x16x16xf32>
    %40 = vector.shape_cast %39 : vector<1x16x16xf32> to vector<16x16xf32>
    %41 = vector.shape_cast %38 : vector<16x16xf32> to vector<1x16x16xf32>
    tpu.vector_store %arg11[%c0_35, %c0_36, %c0_37], %41 {strides = array<i32>} : memref<1x16x16xf32, #tpu.memory_space<vmem>>, vector<1x16x16xf32>,
    return
  }
  func.func @transform_0(%arg0: i32) -> (i32, i32) {
    %c0_i32 = arith.constant 0 : i32
    %c0_i32_0 = arith.constant 0 : i32
    %c0_i32_1 = arith.constant 0 : i32
    return %c0_i32, %c0_i32_0 : i32, i32
  }
  func.func @transform_1(%arg0: i32) -> (i32, i32) {
    %c0_i32 = arith.constant 0 : i32
    %c0_i32_0 = arith.constant 0 : i32
    %c0_i32_1 = arith.constant 0 : i32
    return %c0_i32, %c0_i32_0 : i32, i32
  }
  func.func @transform_2(%arg0: i32) -> (i32, i32) {
    %c0_i32 = arith.constant 0 : i32
    %c0_i32_0 = arith.constant 0 : i32
    %c0_i32_1 = arith.constant 0 : i32
    return %c0_i32, %c0_i32_0 : i32, i32
  }
  func.func @transform_3(%arg0: i32) -> (i32, i32, i32) {
    %c0_i32 = arith.constant 0 : i32
    %c0_i32_0 = arith.constant 0 : i32
    %c0_i32_1 = arith.constant 0 : i32
    return %arg0, %c0_i32, %c0_i32_0 : i32, i32, i32
  }
  func.func @transform_4(%arg0: i32) -> (i32, i32, i32) {
    %c0_i32 = arith.constant 0 : i32
    %c0_i32_0 = arith.constant 0 : i32
    %c0_i32_1 = arith.constant 0 : i32
    return %arg0, %c0_i32, %c0_i32_0 : i32, i32, i32
  }
  func.func @transform_5(%arg0: i32) -> (i32, i32, i32) {
    %c0_i32 = arith.constant 0 : i32
    %c0_i32_0 = arith.constant 0 : i32
    %c0_i32_1 = arith.constant 0 : i32
    return %arg0, %c0_i32, %c0_i32_0 : i32, i32, i32
  }
  func.func @transform_6(%arg0: i32) -> (i32, i32, i32) {
    %c0_i32 = arith.constant 0 : i32
    %c0_i32_0 = arith.constant 0 : i32
    %c0_i32_1 = arith.constant 0 : i32
    return %arg0, %c0_i32, %c0_i32_0 : i32, i32, i32
  }
  func.func @transform_7(%arg0: i32) -> (i32, i32, i32) {
    %c0_i32 = arith.constant 0 : i32
    %c0_i32_0 = arith.constant 0 : i32
    %c0_i32_1 = arith.constant 0 : i32
    return %arg0, %c0_i32, %c0_i32_0 : i32, i32, i32
  }
  func.func @transform_8(%arg0: i32) -> (i32, i32, i32) {
    %c0_i32 = arith.constant 0 : i32
    %c0_i32_0 = arith.constant 0 : i32
    %c0_i32_1 = arith.constant 0 : i32
    return %arg0, %c0_i32, %c0_i32_0 : i32, i32, i32
  }
  func.func @transform_9(%arg0: i32) -> (i32, i32, i32) {
    %c0_i32 = arith.constant 0 : i32
    %c0_i32_0 = arith.constant 0 : i32
    %c0_i32_1 = arith.constant 0 : i32
    return %arg0, %c0_i32, %c0_i32_0 : i32, i32, i32
  }
  func.func @transform_10(%arg0: i32) -> (i32, i32, i32) {
    %c0_i32 = arith.constant 0 : i32
    %c0_i32_0 = arith.constant 0 : i32
    %c0_i32_1 = arith.constant 0 : i32
    return %arg0, %c0_i32, %c0_i32_0 : i32, i32, i32
  }
  func.func @transform_11(%arg0: i32) -> (i32, i32, i32) {
    %c0_i32 = arith.constant 0 : i32
    %c0_i32_0 = arith.constant 0 : i32
    %c0_i32_1 = arith.constant 0 : i32
    return %arg0, %c0_i32, %c0_i32_0 : i32, i32, i32
  }
}

</mosaic_0001>

<bundles_post_ra>
// kernel: bi_encoder_forward.1
= control target key start
LH: loop header
LB: loop body
LE: loop exit
PB: predicated region body
PF: predicated region fallthrough
CT: control target
= control target key end

     0   :  { %s1178_s17 = smov 0   ;;  %s1248_s0 = inlined_call_operand.vmem [shape: bf16[16,16], index: 0, kind: input, shape index: {}]   ;;  %s1249_s1 = inlined_call_operand.vmem [shape: bf16[16,8], index: 1, kind: input, shape index: {}]   ;;  %s1250_s2 = inlined_call_operand.vmem [shape: bf16[16,12], index: 2, kind: input, shape index: {}]   ;;  %s1251_s3 = inlined_call_operand.vmem [shape: bf16[2,12,8], index: 3, kind: input, shape index: {}]   ;;  %s1252_s4 = inlined_call_operand.vmem [shape: f32[2,1,8], index: 4, kind: input, shape index: {}]   ;;  %s1253_s5 = inlined_call_operand.vmem [shape: bf16[2,8,32], index: 5, kind: input, shape index: {}]   ;;  %s1254_s6 = inlined_call_operand.vmem [shape: bf16[2,8,32], index: 6, kind: input, shape index: {}]   ;;  %s1255_s7 = inlined_call_operand.vmem [shape: f32[2,1,32], index: 7, kind: input, shape index: {}]   ;;  %s1256_s8 = inlined_call_operand.vmem [shape: bf16[2,32,16], index: 8, kind: input, shape index: {}]   ;;  %s1257_s9 = inlined_call_operand.vmem [shape: f32[2,1,16], index: 9, kind: input, shape index: {}]   ;;  %s1258_s10 = inlined_call_operand.vmem [shape: f32[2,16,16], index: 10, kind: output, shape index: {0}]   ;;  %s1259_s11 = inlined_call_operand.vmem [shape: f32[2,16,8], index: 11, kind: output, shape index: {1}]  }
   0x1 LB: > { %s1001_s18 = sadd.s32 4294967295, %s1114_s17   ;;  %p1005_p0 = scmp.ge.s32.totalorder %s1114_s17, 1  ;;  %s1114_s17 = sphi %s1178_s17, %s22_s17  }
   0x2   : > { %p392_p1 = scmp.lt.s32.totalorder %s1114_s17, 3 }
   0x4   : > { %p393_p2 = pnand %p1005_p0, %p392_p1 }
   0x5   : > { %p459_p3 = scmp.lt.s32.totalorder (!%p393_p2), %s1001_s18, 1  ;;  %v1116_v0 = vmov (!%p393_p2), 0.0   ;;  %vm1117_vm0 = vmmov (!%p393_p2), 0   ;;  %vm522_vm1 = vcmask (!%p393_p2), 1045504   ;;  %v1103_v3 = vld [vmem:[%s1250_s2] sm:$0xff] (!%p393_p2)   ;;  %vm518_vm2 = vcmask (!%p393_p2), 97280  }
   0x6   : > { %396 = sbr.rel (%p393_p2) target bundleno = 1126 (0x466), region = 60  ;;  %1050 = vmatprep.subr.bf16.mxu0 (!%p393_p2), %v1116_v0  ;;  %1052 = vmatprep.mubr.msk.bf16.mxu0 (!%p393_p2), %vm1117_vm0, %v1116_v0  ;;  %vm580_vm3 = vcmask (!%p393_p2), 1043456   ;;  %vm567_vm4 = vcmask (!%p393_p2), 64512   ;;  %v1104_v16 = vld [vmem:[%s1249_s1] sm:$0xff] (!%p393_p2)   ;;  %vm690_vm5 = vcmask (!%p393_p2), 130048   ;;  %vm754_vm6 = vcmask (!%p393_p2), 261120  }
   0x7   : > { %1056 = vmatprep.subr.bf16.mxu1 (!%p393_p2), %v1116_v0  ;;  %1058 = vmatprep.mubr.msk.bf16.mxu1 (!%p393_p2), %vm1117_vm0, %v1116_v0  ;;  %v1105_v22 = vld [vmem:[%s1248_s0] sm:$0xff] (!%p393_p2)  }
   0xd   : > { %s1261_s18 = smov (!%p459_p3, %s1001_s18), 1 }
   0xe   : > { %s1033_s19 = sshll.u32 %s1261_s18, 3  ;;  %s1008_s25 = sshll.u32 %s1261_s18, 2 }
   0xf   : > { %s463_s22 = scalar_lea.vmem %s1251_s3, %s1033_s19  ;;  %s474_s28 = scalar_lea.vmem %s1254_s6, %s1008_s25 }
  0x10   : > { %v1102_v1 = vld [vmem:[%s463_s22] sm:$0x3f]   ;;  %s470_s12 = scalar_lea.vmem %s1253_s5, %s1008_s25  ;;  %s466_s15 = scalar_lea.vmem %s1252_s4, %s1261_s18 }
  0x11   : > { %v524_v2 = vsel %vm522_vm1, %v1102_v1, 0  ;;  %v576_v4 = vld [vmem:[%s474_s28] sm:$0xf]  ;;  %s1210_s16 = sshll.u32 %s1261_s18, 4 }
  0x12   : > { %1051 = vmatpush3.bf16.msra.mxu0 %v524_v2  ;;  %v582_v5 = vsel %vm580_vm3, %v576_v4, 0  ;;  %v575_v6 = vld [vmem:[%s470_s12] sm:$0xf]  ;;  %s495_s21 = scalar_lea.vmem %s1259_s11, %s1210_s16  ;;  %s482_s28 = scalar_lea.vmem %s1256_s8, %s1210_s16 }
  0x13   : > { %1068 = vmatprep.subr.bf16.mxu0 %v1116_v0  ;;  %1057 = vmatpush3.bf16.msra.mxu1 %v582_v5  ;;  %v634_v7 = vsel %vm580_vm3, %v575_v6, 0  ;;  %v1016_v8 = vld [vmem:[%s466_s15] ss:$0 sm:$0xff]  ;;  %v1107_v24 = vld [vmem:[%s482_s28 + $0x8] sm:$0xff]   ;;  %s477_s12 = scalar_lea.vmem %s1255_s7, %s1261_s18  ;;  %s485_s15 = scalar_lea.vmem %s1257_s9, %s1261_s18 }
  0x14   : > { %1062 = vmatprep.subr.bf16.mxu1 %v1116_v0  ;;  %v1106_v23 = vld [vmem:[%s482_s28] sm:$0xff]  }
  0x15   : > { %1053 = vmatmul.mubr.msk.bf16.vlgmr.msra.gmra.mrb[0].mxu0 %vm518_vm2, %v1103_v3  ;;  %v1023_v25 = vld [vmem:[%s477_s12] ss:$0 sm:$0xff] }
  0x16   : > { %1070 = vmatprep.mubr.msk.bf16.mxu0 %vm1117_vm0, %v1116_v0  ;;  %v1029_v40 = vld [vmem:[%s485_s15] ss:$0 sm:$0xff] }
  0xe8   : > { %v560_v9 = vpop.f32.mrb[0].mxu0 }
  0xe9   : > { %v561_v10 = vadd.f32 %v1016_v8, %v560_v9  ;;  %v1054_v11 = vpop.f32.mrb[1].mxu0 }
  0xea   : > { %v563_v12 = vpop.f32.mrb[2].mxu0 }
  0xeb   : > { %v564_v13 = vadd.f32 %v1016_v8, %v563_v12  ;;  %v1055_v14 = vpop.f32.mrb[3].mxu0  ;;  %568 = vst.msk [vmem:[%s495_s21] sm:$0xff] %vm567_vm4, %v561_v10 }
  0xed   : > { %v570_v15 = vpack.c.bf16 %v564_v13, %v561_v10  ;;  %569 = vst.msk [vmem:[%s495_s21 + $0x8] sm:$0xff] %vm567_vm4, %v564_v13  ;;  %s490_s21 = scalar_lea.vmem %s1258_s10, %s1210_s16 }
  0xef   : > { %1059 = vmatmul.mubr.msk.bf16.vlgmr.msra.gmra.mrb[0].mxu1 %vm567_vm4, %v570_v15 }
  0xf0   : > { %1063 = vmatpush3.bf16.msra.mxu1 %v634_v7  ;;  %1064 = vmatprep.mubr.msk.bf16.mxu1 %vm1117_vm0, %v1116_v0 }
  0xf1   : > { %1082 = vmatprep.subr.bf16.mxu1 %v1116_v0 }
  0xfb   : > { %1065 = vmatmul.mubr.msk.bf16.vlgmr.msra.gmra.mrb[0].mxu1 %vm567_vm4, %v1104_v16 }
  0xfc   : > { %1084 = vmatprep.mubr.msk.bf16.mxu1 %vm1117_vm0, %v1116_v0 }
 0x1ce   : > { %v670_v17 = vpop.f32.mrb[0].mxu1 }
 0x1cf   : > { %v1066_v18 = vpop.f32.mrb[1].mxu1 }
 0x1d0   : > { %v673_v19 = vpop.f32.mrb[2].mxu1 }
 0x1d1   : > { %v677_v20 = vpack.c.bf16 %v673_v19, %v670_v17  ;;  %v1067_v21 = vpop.f32.mrb[3].mxu1 }
 0x1d3   : > { %1069 = vmatpush3.bf16.msra.mxu0 %v677_v20 }
 0x1d4   : > { %1074 = vmatprep.subr.bf16.mxu0 %v1116_v0 }
 0x1d6   : > { %1071 = vmatmul.mubr.msk.bf16.vlgmr.msra.gmra.mrb[4].mxu0 %vm690_vm5, %v1105_v22 }
 0x1d7   : > { %1078 = vmatprep.mubr.msk.bf16.mxu0 %vm1117_vm0, %v1116_v0  ;;  %1075 = vmatpush3.bf16.msra.mxu0 %v1106_v23 }
 0x1d8   : > { %1076 = vmatprep.subr.bf16.mxu0 %v1116_v0 }
 0x1db   : > { %1077 = vmatpush3.bf16.msra.mxu0 %v1107_v24 }
 0x2a9   : > { %v728_v26 = vpop.f32.mrb[4].mxu0 }
 0x2aa   : > { %v729_v27 = vadd.f32 %v1023_v25, %v728_v26  ;;  %v1072_v28 = vpop.f32.mrb[5].mxu0 }
 0x2ab   : > { %v731_v29 = vpop.f32.mrb[6].mxu0 }
 0x2ac   : > { %v732_v30 = vadd.f32 %v1023_v25, %v731_v29  ;;  %v1073_v31 = vpop.f32.mrb[7].mxu0  ;;  %v735_v32 = vmax.f32 %v729_v27, 0.0 }
 0x2ae   : > { %v736_v33 = vmax.f32 %v732_v30, 0.0 }
 0x2b0   : > { %v737_v34 = vpack.c.bf16 %v736_v33, %v735_v32 }
 0x2b2   : > { %1079 = vmatmul.mubr.msk.bf16.vlgmr.msra.gmra.mrb[8].mxu0 %vm754_vm6, %v737_v34 }
 0x385   : > { %v792_v35 = vpop.f32.mrb[8].mxu0 }
 0x386   : > { %v1080_v36 = vpop.f32.mrb[9].mxu0 }
 0x387   : > { %v795_v37 = vpop.f32.mrb[10].mxu0 }
 0x388   : > { %v799_v38 = vpack.c.bf16 %v795_v37, %v792_v35  ;;  %v1081_v39 = vpop.f32.mrb[11].mxu0 }
 0x38a   : > { %1083 = vmatpush3.bf16.msra.mxu1 %v799_v38 }
 0x38d   : > { %1085 = vmatmul.mubr.msk.bf16.vlgmr.msra.gmra.mrb[4].mxu1 %vm690_vm5, %v1105_v22 }
 0x460   : > { %v841_v41 = vpop.f32.mrb[4].mxu1 }
 0x461   : > { %v842_v42 = vadd.f32 %v1029_v40, %v841_v41  ;;  %v1086_v43 = vpop.f32.mrb[5].mxu1 }
 0x462   : > { %v844_v44 = vpop.f32.mrb[6].mxu1 }
 0x463   : > { %848 = vst.msk [vmem:[%s490_s21] sm:$0xff] %vm690_vm5, %v842_v42  ;;  %v845_v45 = vadd.f32 %v1029_v40, %v844_v44  ;;  %v1087_v46 = vpop.f32.mrb[7].mxu1 }
 0x465   : > { %849 = vst.msk [vmem:[%s490_s21 + $0x8] sm:$0xff] %vm690_vm5, %v845_v45 }
 0x466 PF: > { %s22_s17 = sadd.s32 1, %s1114_s17  }
 0x467   : > { %p19_p4 = scmp.ge.s32.totalorder %s22_s17, 4  }
 0x469   :  { %21 = sbr.rel (!%p19_p4) target bundleno = 1 (0x1), region = 120 }

</bundles_post_ra>
